<compile_context>
chip_gen: v7x
topology: tpu7x:2x2x1
jax: 0.10.0
libtpu: 0.0.40
codegen_flags: <defaults>
</compile_context>

<pallas_src>
import jax
import jax.numpy as jnp
from jax.experimental import pallas as pl
from jax.experimental.pallas import tpu as pltpu

_EPS = 1e-5


def _round_up(x, m):
    return (x + m - 1) // m * m


# --------------------------------------------------------------------------
# Pallas kernels
# --------------------------------------------------------------------------
def _gemm_bias_relu_kernel(a_ref, w_ref, b_ref, o_ref):
    """Single-K tile: o = relu(a @ w + b), f32 math, bf16 store."""
    y = jnp.dot(a_ref[...], w_ref[...], preferred_element_type=jnp.float32)
    y = y + b_ref[...]
    o_ref[...] = jnp.maximum(y, 0.0).astype(o_ref.dtype)


def _gemm_bias_relu_acc_kernel(a_ref, w_ref, b_ref, o_ref, acc_ref):
    """Fallback for very large K: k-gridded f32 accumulator."""
    @pl.when(pl.program_id(2) == 0)
    def _init():
        acc_ref[...] = jnp.zeros_like(acc_ref)

    acc_ref[...] += jnp.dot(
        a_ref[...], w_ref[...], preferred_element_type=jnp.float32
    )

    @pl.when(pl.program_id(2) == pl.num_programs(2) - 1)
    def _finalize():
        y = acc_ref[...] + b_ref[...]
        o_ref[...] = jnp.maximum(y, 0.0).astype(o_ref.dtype)


def fused_matmul_bias_relu(a, w, bias, *, tm=1024, tn=512, tk=512,
                           out_dtype=jnp.bfloat16):
    """relu((a @ w) + bias) as a gridded Pallas TPU kernel.

    a: (M, K), w: (K, N), bias: (N,).  Operands are cast to bf16 for the MXU;
    accumulation and the epilogue stay in f32; the output is bf16.
    """
    M, K = a.shape
    Kw, N = w.shape
    assert K == Kw

    Np = _round_up(N, 128)
    tn = min(tn, Np)
    if Np % tn:
        tn = 128
    tm = min(tm, _round_up(M, 8))
    Mp = _round_up(M, tm)

    b_p = jnp.pad(bias.astype(jnp.float32), (0, Np - N)).reshape(1, Np)

    vmem_limit = 32 * 1024 * 1024

    if K <= 2048:
        # Fast path: whole K in one block (no K padding, no accumulator).
        a_p = jnp.pad(a, ((0, Mp - M), (0, 0))).astype(jnp.bfloat16)
        w_p = jnp.pad(w, ((0, 0), (0, Np - N))).astype(jnp.bfloat16)
        out = pl.pallas_call(
            _gemm_bias_relu_kernel,
            out_shape=jax.ShapeDtypeStruct((Mp, Np), out_dtype),
            grid_spec=pltpu.PrefetchScalarGridSpec(
                num_scalar_prefetch=0,
                grid=(Mp // tm, Np // tn),
                in_specs=[
                    pl.BlockSpec((tm, K), lambda i, j: (i, 0)),
                    pl.BlockSpec((K, tn), lambda i, j: (0, j)),
                    pl.BlockSpec((1, tn), lambda i, j: (0, j)),
                ],
                out_specs=pl.BlockSpec((tm, tn), lambda i, j: (i, j)),
            ),
            compiler_params=pltpu.CompilerParams(
                dimension_semantics=("parallel", "parallel"),
                vmem_limit_bytes=vmem_limit,
            ),
        )(a_p, w_p, b_p)
    else:
        Kp = _round_up(K, 128)
        tk = min(tk, Kp)
        if Kp % tk:
            tk = 128
        a_p = jnp.pad(a, ((0, Mp - M), (0, Kp - K))).astype(jnp.bfloat16)
        w_p = jnp.pad(w, ((0, Kp - K), (0, Np - N))).astype(jnp.bfloat16)
        out = pl.pallas_call(
            _gemm_bias_relu_acc_kernel,
            out_shape=jax.ShapeDtypeStruct((Mp, Np), out_dtype),
            grid_spec=pltpu.PrefetchScalarGridSpec(
                num_scalar_prefetch=0,
                grid=(Mp // tm, Np // tn, Kp // tk),
                in_specs=[
                    pl.BlockSpec((tm, tk), lambda i, j, k: (i, k)),
                    pl.BlockSpec((tk, tn), lambda i, j, k: (k, j)),
                    pl.BlockSpec((1, tn), lambda i, j, k: (0, j)),
                ],
                out_specs=pl.BlockSpec((tm, tn), lambda i, j, k: (i, j)),
                scratch_shapes=[pltpu.VMEM((tm, tn), jnp.float32)],
            ),
            compiler_params=pltpu.CompilerParams(
                dimension_semantics=("parallel", "parallel", "arbitrary"),
                vmem_limit_bytes=vmem_limit,
            ),
        )(a_p, w_p, b_p)

    return out[:M, :N]


# --------------------------------------------------------------------------
# Plain-JAX glue: sub-pixel decomposition of the stride-2 transposed conv.
# --------------------------------------------------------------------------
_TAPS = ((0, 0), (0, 1), (1, 0), (1, 1))     # input-pixel offsets (dr, dc)
_PHASES = ((0, 0), (0, 1), (1, 0), (1, 1))   # output sub-pixel (pr, pc)


def _fold_bn(gamma, beta, mean, var):
    scale = gamma / jnp.sqrt(var + _EPS)
    return scale, beta - mean * scale


def _build_subpixel_weight(w_t):
    """Torch ConvTranspose2d weight (Ci, Co, 3, 3) -> (4*Ci, 4*Co) matrix.

    out[2m+pr, 2n+pc] += x[m+dr, n+dc] @ W[:, :, kh, kw]
    with kh = pr - 2*dr + 1 and kw = pc - 2*dc + 1 (zero block if out of range).
    """
    ci, co = w_t.shape[0], w_t.shape[1]
    rows = []
    for dr, dc in _TAPS:
        cols = []
        for pr, pc in _PHASES:
            kh = pr - 2 * dr + 1
            kw = pc - 2 * dc + 1
            if 0 <= kh <= 2 and 0 <= kw <= 2:
                cols.append(w_t[:, :, kh, kw])
            else:
                cols.append(jnp.zeros((ci, co), w_t.dtype))
        rows.append(jnp.concatenate(cols, axis=1))
    return jnp.concatenate(rows, axis=0)        # (4*Ci, 4*Co)


def decoder_block(x_nchw, params):
    """ConvTranspose2d(3, s=2, p=1, op=1, bias=False) + BN + ReLU.  NCHW in/out."""
    w_t = params["weight"]                       # (Ci, Co, 3, 3)
    ci, co = w_t.shape[0], w_t.shape[1]
    scale, bias = _fold_bn(params["gamma"], params["beta"],
                           params["running_mean"], params["running_var"])

    # Fold the BN scale into the (static) sub-pixel weight; only bias + ReLU
    # remain in the kernel epilogue.
    w_big = _build_subpixel_weight(w_t)          # (4*Ci, 4*Co), f32
    scale4 = jnp.tile(scale, 4)                  # same BN affine per phase
    bias4 = jnp.tile(bias, 4)
    w_big = w_big * scale4[None, :]

    x = jnp.transpose(x_nchw, (0, 2, 3, 1))      # NHWC
    b, h, w, _ = x.shape
    # One zero row/col on the bottom/right covers the (kh,kw)=0 boundary taps.
    xp = jnp.pad(x, ((0, 0), (0, 1), (0, 1), (0, 0))).astype(jnp.bfloat16)
    taps = [xp[:, dr:dr + h, dc:dc + w, :] for dr, dc in _TAPS]
    a = jnp.concatenate(taps, axis=-1).reshape(b * h * w, 4 * ci)

    y = fused_matmul_bias_relu(a, w_big, bias4)              # bf16 (B*H*W, 4*Co)
    y = y.reshape(b, h, w, 2, 2, co)                         # (..., pr, pc, Co)
    y = jnp.transpose(y, (0, 1, 3, 2, 4, 5)).reshape(b, 2 * h, 2 * w, co)
    # Back to NCHW / f32 to match the PyTorch module's output layout & dtype.
    return jnp.transpose(y, (0, 3, 1, 2)).astype(jnp.float32)


# --------------------------------------------------------------------------
# Pure-JAX reference (exact ConvTranspose2d semantics) for a sanity check.
# --------------------------------------------------------------------------
def _reference(x_nchw, params):
    w_t = params["weight"]
    w = jnp.flip(w_t, (2, 3)).transpose(1, 0, 2, 3)          # (Co, Ci, 3, 3)
    y = jax.lax.conv_general_dilated(
        x_nchw, w, window_strides=(1, 1),
        padding=((1, 2), (1, 2)), lhs_dilation=(2, 2),
        dimension_numbers=("NCHW", "OIHW", "NCHW"))
    scale, bias = _fold_bn(params["gamma"], params["beta"],
                           params["running_mean"], params["running_var"])
    y = y * scale[None, :, None, None] + bias[None, :, None, None]
    return jnp.maximum(y, 0.0)


# --------------------------------------------------------------------------
if __name__ == "__main__":
    Ci, Co = 4, 8
    B, H, W = 2, 16, 16

    key = jax.random.PRNGKey(0)
    kw, kg, kb, kx = jax.random.split(key, 4)
    params = {
        "weight": 0.1 * jax.random.normal(kw, (Ci, Co, 3, 3), jnp.float32),
        "gamma": 1.0 + 0.05 * jax.random.normal(kg, (Co,), jnp.float32),
        "beta": 0.05 * jax.random.normal(kb, (Co,), jnp.float32),
        "running_mean": jnp.zeros((Co,), jnp.float32),
        "running_var": jnp.ones((Co,), jnp.float32),
    }
    x = jax.random.normal(kx, (B, Ci, H, W), jnp.float32)    # NCHW input

    out = jax.jit(decoder_block)(x, params)
    jax.block_until_ready(out)
    assert out.shape == (B, Co, 2 * H, 2 * W), out.shape

    ref = _reference(x, params)
    max_err = float(jnp.max(jnp.abs(out - ref)))
    assert jnp.allclose(out, ref, atol=5e-2, rtol=5e-2), max_err
    print("KERNEL_OK")
</pallas_src>

<mosaic_0001>
module attributes {stable_mosaic.version = 11 : i64} {
  func.func @_gemm_bias_relu_kernel(%arg0: i32, %arg1: i32, %arg2: memref<512x16xbf16, #tpu.memory_space<vmem>>, %arg3: memref<16x128xbf16, #tpu.memory_space<vmem>>, %arg4: memref<1x128xf32, #tpu.memory_space<vmem>>, %arg5: memref<512x128xbf16, #tpu.memory_space<vmem>>) attributes {dimension_semantics = [#tpu.dimension_semantics<parallel>, #tpu.dimension_semantics<parallel>], iteration_bounds = array<i64: 1, 1>, scalar_prefetch = 0 : i64, scratch_operands = 0 : i64, tpu.core_type = #tpu.core_type<tc>, window_params = [{transform_indices = @transform_0, window_bounds = array<i64: 512, 16>}, {transform_indices = @transform_1, window_bounds = array<i64: 16, 128>}, {transform_indices = @transform_2, window_bounds = array<i64: 1, 128>}, {transform_indices = @transform_3, window_bounds = array<i64: 512, 128>}]} {
    %c0 = arith.constant 0 : index
    %c0_0 = arith.constant 0 : index
    %0 = vector.load %arg2[%c0, %c0_0] : memref<512x16xbf16, #tpu.memory_space<vmem>>, vector<512x16xbf16>
    %c0_1 = arith.constant 0 : index
    %c0_2 = arith.constant 0 : index
    %1 = vector.load %arg3[%c0_1, %c0_2] : memref<16x128xbf16, #tpu.memory_space<vmem>>, vector<16x128xbf16>
    %cst = arith.constant dense<0.000000e+00> : vector<512x128xf32>
    %2 = tpu.matmul %0, %1, %cst {dimension_numbers = #tpu.dot_dimension_numbers<[1], [0], [0], [1], [0, 0, 1, 1], [], []>} : vector<512x16xbf16>, vector<16x128xbf16>, vector<512x128xf32> -> vector<512x128xf32>
    %c0_3 = arith.constant 0 : index
    %c0_4 = arith.constant 0 : index
    %3 = vector.load %arg4[%c0_3, %c0_4] : memref<1x128xf32, #tpu.memory_space<vmem>>, vector<1x128xf32>
    %4 = vector.broadcast %3 : vector<1x128xf32> to vector<512x128xf32>
    %5 = arith.addf %2, %4 : vector<512x128xf32>
    %cst_5 = arith.constant 0.000000e+00 : f32
    %6 = vector.broadcast %cst_5 : f32 to vector<512x128xf32>
    %7 = arith.maximumf %5, %6 : vector<512x128xf32>
    %8 = arith.truncf %7 : vector<512x128xf32> to vector<512x128xbf16>
    %c0_6 = arith.constant 0 : index
    %c0_7 = arith.constant 0 : index
    %9 = vector.load %arg5[%c0_6, %c0_7] : memref<512x128xbf16, #tpu.memory_space<vmem>>, vector<512x128xbf16>
    tpu.vector_store %arg5[%c0_6, %c0_7], %8 {strides = array<i32>} : memref<512x128xbf16, #tpu.memory_space<vmem>>, vector<512x128xbf16>,
    return
  }
  func.func @transform_0(%arg0: i32, %arg1: i32) -> (i32, i32) {
    %c0_i32 = arith.constant 0 : i32
    %c0_i32_0 = arith.constant 0 : i32
    return %arg0, %c0_i32 : i32, i32
  }
  func.func @transform_1(%arg0: i32, %arg1: i32) -> (i32, i32) {
    %c0_i32 = arith.constant 0 : i32
    %c0_i32_0 = arith.constant 0 : i32
    return %c0_i32, %arg1 : i32, i32
  }
  func.func @transform_2(%arg0: i32, %arg1: i32) -> (i32, i32) {
    %c0_i32 = arith.constant 0 : i32
    %c0_i32_0 = arith.constant 0 : i32
    return %c0_i32, %arg1 : i32, i32
  }
  func.func @transform_3(%arg0: i32, %arg1: i32) -> (i32, i32) {
    %c0_i32 = arith.constant 0 : i32
    return %arg0, %arg1 : i32, i32
  }
}

</mosaic_0001>

<bundles_post_ra>
// kernel: tile.17
= control target key start
LH: loop header
LB: loop body
LE: loop exit
PB: predicated region body
PF: predicated region fallthrough
CT: control target
= control target key end

     0   :  { %s22_s0 = inlined_call_operand.vmem [shape: f32[8], index: 0, kind: input, shape index: {}]   ;;  %s23_s1 = inlined_call_operand.vmem [shape: f32[4,8], index: 1, kind: output, shape index: {}]  }
   0x1   :  { %v4_v0 = vld [vmem:[%s22_s0] ss:$0 sm:$0xff] }
   0x2   :  { %5 = vst [vmem:[%s23_s1] sm:$0xf] %v4_v0 }

// kernel: tile.18
= control target key start
LH: loop header
LB: loop body
LE: loop exit
PB: predicated region body
PF: predicated region fallthrough
CT: control target
= control target key end

     0   :  { %vm7_vm0 = vcmask 64512   ;;  %s37_s8 = smov 8   ;;  %s38_s9 = smov 16   ;;  %vm13_vm1 = vcmask 261312   ;;  %vm19_vm2 = vcmask 195712   ;;  %vm25_vm3 = vcmask 130112   ;;  %s55_s0 = inlined_call_operand.vmem [shape: f32[4,8], index: 0, kind: input, shape index: {}]   ;;  %s56_s1 = inlined_call_operand.vmem [shape: f32[32], index: 1, kind: output, shape index: {}]  }
   0x1   :  { %v4_v0 = vld [vmem:[%s55_s0] sm:$0xf]  ;;  %s36_s0 = smov 24  }
   0x2   :  { %5 = vst [vmem:[#allocation1] sm:$0xf] %v4_v0 }
   0x9   :  { %v10_v1 = vld [vmem:[#allocation1 + $0x3] sm:$0x1]   ;;  %v22_v2 = vld [vmem:[#allocation1 + $0x1] sm:$0x1]   ;;  %v6_v3 = vld [vmem:[#allocation1] sm:$0x1]  }
   0xa   :  { %11 = vrot.lane.b32.xlu0 %v10_v1, %s36_s0  ;;  %23 = vrot.lane.b32.xlu1 %v22_v2, %s37_s8  ;;  %v16_v4 = vld [vmem:[#allocation1 + $0x2] sm:$0x1]   ;;  %8 = vst.msk [vmem:[#allocation0] sm:$0x1] %vm7_vm0, %v6_v3  }
   0xe   :  { %17 = vrot.lane.b32.xlu0 %v16_v4, %s38_s9 }
  0x7c   :  { %v12_v5 = vpop.permute.xlu0 %11   ;;  %v24_v6 = vpop.permute.xlu1 %23  }
  0x7d   :  { %14 = vst.msk [vmem:[#allocation0] sm:$0x1] %vm13_vm1, %v12_v5  }
  0x80   :  { %v18_v7 = vpop.permute.xlu0 %17  }
  0x81   :  { %20 = vst.msk [vmem:[#allocation0] sm:$0x1] %vm19_vm2, %v18_v7  }
  0x82   :  { %26 = vst.msk [vmem:[#allocation0] sm:$0x1] %vm25_vm3, %v24_v6  }
  0x89   :  { %v30_v8 = vld [vmem:[#allocation0] sm:$0x1] }
  0x8a   :  { %32 = vst [vmem:[%s56_s1] sm:$0x1] %v30_v8 }

// kernel: decoder_block.1
= control target key start
LH: loop header
LB: loop body
LE: loop exit
PB: predicated region body
PF: predicated region fallthrough
CT: control target
= control target key end

     0   :  { %vm254_vm0 = vcmask 130048   ;;  %s1863_s1 = inlined_call_operand.vmem [shape: bf16[16,128], index: 1, kind: input, shape index: {}]   ;;  %s1864_s0 = inlined_call_operand.vmem [shape: bf16[512,16], index: 0, kind: input, shape index: {}]   ;;  %s1865_s2 = inlined_call_operand.vmem [shape: f32[1,128], index: 2, kind: input, shape index: {}]   ;;  %s1866_s3 = inlined_call_operand.vmem [shape: bf16[512,128], index: 3, kind: output, shape index: {}]  }
   0x1   :  { %v1514_v0 = vld [vmem:[%s1863_s1] sm:$0xff]   ;;  %v1517_v3 = vld [vmem:[%s1864_s0 + $0x8] sm:$0xff]   ;;  %v1519_v5 = vld [vmem:[%s1864_s0 + $0x10] sm:$0xff]  }
   0x2   :  { %v1515_v1 = vld [vmem:[%s1864_s0] sm:$0xff]   ;;  %1446 = vmatprep.subr.bf16.mxu0 %v1514_v0  ;;  %1512 = vmatprep.subr.bf16.mxu1 %v1514_v0  ;;  %v1518_v4 = vld [vmem:[%s1864_s0 + $0x88] sm:$0xff]   ;;  %v1520_v6 = vld [vmem:[%s1864_s0 + $0x90] sm:$0xff]  }
   0x3   :  { %v1516_v2 = vld [vmem:[%s1864_s0 + $0x80] sm:$0xff]   ;;  %1447 = vmatpush3.bf16.msra.mxu0 %v1514_v0  ;;  %1513 = vmatpush3.bf16.msra.mxu1 %v1514_v0  ;;  %v1521_v7 = vld [vmem:[%s1864_s0 + $0x18] sm:$0xff]   ;;  %v1525_v11 = vld [vmem:[%s1864_s0 + $0x28] sm:$0xff]  }
   0x4   :  { %1448 = vmatprep.mubr.msk.bf16.mxu0 %vm254_vm0, %v1515_v1  ;;  %1480 = vmatprep.mubr.msk.bf16.mxu1 %vm254_vm0, %v1516_v2  ;;  %v1522_v8 = vld [vmem:[%s1864_s0 + $0x98] sm:$0xff]   ;;  %v1523_v9 = vld [vmem:[%s1864_s0 + $0x20] sm:$0xff]   ;;  %v1526_v12 = vld [vmem:[%s1864_s0 + $0xa8] sm:$0xff]  }
   0x5   :  { %v1524_v10 = vld [vmem:[%s1864_s0 + $0xa0] sm:$0xff]   ;;  %v1527_v13 = vld [vmem:[%s1864_s0 + $0x30] sm:$0xff]   ;;  %v1529_v15 = vld [vmem:[%s1864_s0 + $0x38] sm:$0xff]  }
   0x6   :  { %1449 = vmatmul.mubr.msk.bf16.vlgmr.msra.gmra.mrb[0].mxu0 %vm254_vm0, %v1517_v3  ;;  %1481 = vmatmul.mubr.msk.bf16.vlgmr.msra.gmra.mrb[0].mxu1 %vm254_vm0, %v1518_v4  ;;  %v1528_v14 = vld [vmem:[%s1864_s0 + $0xb0] sm:$0xff]   ;;  %v1530_v16 = vld [vmem:[%s1864_s0 + $0xb8] sm:$0xff]   ;;  %v1531_v17 = vld [vmem:[%s1864_s0 + $0x40] sm:$0xff]  }
   0x7   :  { %1452 = vmatprep.mubr.msk.bf16.mxu0 %vm254_vm0, %v1519_v5  ;;  %1484 = vmatprep.mubr.msk.bf16.mxu1 %vm254_vm0, %v1520_v6  ;;  %v1532_v18 = vld [vmem:[%s1864_s0 + $0xc0] sm:$0xff]   ;;  %v1533_v19 = vld [vmem:[%s1864_s0 + $0x48] sm:$0xff]   ;;  %v1535_v21 = vld [vmem:[%s1864_s0 + $0x50] sm:$0xff]  }
   0x8   :  { %v1534_v20 = vld [vmem:[%s1864_s0 + $0xc8] sm:$0xff]   ;;  %v1536_v22 = vld [vmem:[%s1864_s0 + $0xd0] sm:$0xff]   ;;  %v1537_v23 = vld [vmem:[%s1864_s0 + $0x58] sm:$0xff]  }
   0x9   :  { %v1538_v24 = vld [vmem:[%s1864_s0 + $0xd8] sm:$0xff]   ;;  %v1539_v25 = vld [vmem:[%s1864_s0 + $0x60] sm:$0xff]   ;;  %v1541_v27 = vld [vmem:[%s1864_s0 + $0x68] sm:$0xff]  }
   0xa   :  { %v1540_v26 = vld [vmem:[%s1864_s0 + $0xe0] sm:$0xff]   ;;  %v1542_v28 = vld [vmem:[%s1864_s0 + $0xe8] sm:$0xff]   ;;  %v1543_v29 = vld [vmem:[%s1864_s0 + $0x70] sm:$0xff]  }
   0xb   :  { %v1544_v30 = vld [vmem:[%s1864_s0 + $0xf0] sm:$0xff]   ;;  %v1545_v31 = vld [vmem:[%s1864_s0 + $0x78] sm:$0xff]   ;;  %v1701_v33 = vld [vmem:[%s1865_s2] ss:$0 sm:$0xff] }
   0xc   :  { %v1546_v32 = vld [vmem:[%s1864_s0 + $0xf8] sm:$0xff]  }
   0xe   :  { %1453 = vmatmul.mubr.msk.bf16.gmra.mrb[4].mxu0 %vm254_vm0, %v1521_v7  ;;  %1485 = vmatmul.mubr.msk.bf16.gmra.mrb[4].mxu1 %vm254_vm0, %v1522_v8 }
   0xf   :  { %1456 = vmatprep.mubr.msk.bf16.mxu0 %vm254_vm0, %v1523_v9  ;;  %1488 = vmatprep.mubr.msk.bf16.mxu1 %vm254_vm0, %v1524_v10 }
  0x16   :  { %1457 = vmatmul.mubr.msk.bf16.gmra.mrb[8].mxu0 %vm254_vm0, %v1525_v11  ;;  %1489 = vmatmul.mubr.msk.bf16.gmra.mrb[8].mxu1 %vm254_vm0, %v1526_v12 }
  0x17   :  { %1460 = vmatprep.mubr.msk.bf16.mxu0 %vm254_vm0, %v1527_v13  ;;  %1492 = vmatprep.mubr.msk.bf16.mxu1 %vm254_vm0, %v1528_v14 }
  0x1e   :  { %1461 = vmatmul.mubr.msk.bf16.gmra.mrb[12].mxu0 %vm254_vm0, %v1529_v15  ;;  %1493 = vmatmul.mubr.msk.bf16.gmra.mrb[12].mxu1 %vm254_vm0, %v1530_v16 }
  0x1f   :  { %1464 = vmatprep.mubr.msk.bf16.mxu0 %vm254_vm0, %v1531_v17  ;;  %1496 = vmatprep.mubr.msk.bf16.mxu1 %vm254_vm0, %v1532_v18 }
  0x26   :  { %1465 = vmatmul.mubr.msk.bf16.gmra.mrb[16].mxu0 %vm254_vm0, %v1533_v19  ;;  %1497 = vmatmul.mubr.msk.bf16.gmra.mrb[16].mxu1 %vm254_vm0, %v1534_v20 }
  0x27   :  { %1468 = vmatprep.mubr.msk.bf16.mxu0 %vm254_vm0, %v1535_v21  ;;  %1500 = vmatprep.mubr.msk.bf16.mxu1 %vm254_vm0, %v1536_v22 }
  0x2e   :  { %1469 = vmatmul.mubr.msk.bf16.gmra.mrb[20].mxu0 %vm254_vm0, %v1537_v23  ;;  %1501 = vmatmul.mubr.msk.bf16.gmra.mrb[20].mxu1 %vm254_vm0, %v1538_v24 }
  0x2f   :  { %1472 = vmatprep.mubr.msk.bf16.mxu0 %vm254_vm0, %v1539_v25  ;;  %1504 = vmatprep.mubr.msk.bf16.mxu1 %vm254_vm0, %v1540_v26 }
  0x36   :  { %1473 = vmatmul.mubr.msk.bf16.gmra.mrb[24].mxu0 %vm254_vm0, %v1541_v27  ;;  %1505 = vmatmul.mubr.msk.bf16.gmra.mrb[24].mxu1 %vm254_vm0, %v1542_v28 }
  0x37   :  { %1476 = vmatprep.mubr.msk.bf16.mxu0 %vm254_vm0, %v1543_v29  ;;  %1508 = vmatprep.mubr.msk.bf16.mxu1 %vm254_vm0, %v1544_v30 }
  0x3e   :  { %1477 = vmatmul.mubr.msk.bf16.gmra.mrb[28].mxu0 %vm254_vm0, %v1545_v31  ;;  %1509 = vmatmul.mubr.msk.bf16.gmra.mrb[28].mxu1 %vm254_vm0, %v1546_v32 }
  0xd9   :  { %v1450_v34 = vpop.f32.mrb[0].mxu0  ;;  %v1482_v35 = vpop.f32.mrb[0].mxu1 }
  0xda   :  { %v394_v36 = vadd.f32 %v1450_v34, %v1701_v33  ;;  %v522_v37 = vadd.f32 %v1482_v35, %v1701_v33  ;;  %v385_v38 = vpop.f32.mrb[1].mxu0  ;;  %v513_v39 = vpop.f32.mrb[1].mxu1 }
  0xdb   :  { %v386_v40 = vadd.f32 %v1701_v33, %v385_v38  ;;  %v514_v41 = vadd.f32 %v1701_v33, %v513_v39  ;;  %v1451_v42 = vpop.f32.mrb[2].mxu0  ;;  %v1483_v43 = vpop.f32.mrb[2].mxu1 }
  0xdc   :  { %v397_v44 = vadd.f32 %v1451_v42, %v1701_v33  ;;  %v525_v45 = vadd.f32 %v1483_v43, %v1701_v33  ;;  %v388_v46 = vpop.f32.mrb[3].mxu0  ;;  %v516_v47 = vpop.f32.mrb[3].mxu1  ;;  %v642_v50 = vmax.f32 %v394_v36, 0.0  ;;  %v674_v51 = vmax.f32 %v522_v37, 0.0 }
  0xdd   :  { %v389_v48 = vadd.f32 %v1701_v33, %v388_v46  ;;  %v517_v49 = vadd.f32 %v1701_v33, %v516_v47  ;;  %v640_v54 = vmax.f32 %v386_v40, 0.0  ;;  %v672_v55 = vmax.f32 %v514_v41, 0.0 }
  0xde   :  { %v643_v52 = vmax.f32 %v397_v44, 0.0  ;;  %v675_v53 = vmax.f32 %v525_v45, 0.0 }
  0xdf   :  { %v641_v56 = vmax.f32 %v389_v48, 0.0  ;;  %v673_v57 = vmax.f32 %v517_v49, 0.0 }
  0xe0   :  { %v1230_v58 = vpack.c.bf16 %v643_v52, %v642_v50  ;;  %v1310_v59 = vpack.c.bf16 %v675_v53, %v674_v51 }
  0xe1   :  { %v1225_v60 = vpack.c.bf16 %v641_v56, %v640_v54  ;;  %v1305_v61 = vpack.c.bf16 %v673_v57, %v672_v55  ;;  %v1454_v62 = vpop.f32.mrb[4].mxu0  ;;  %v1486_v63 = vpop.f32.mrb[4].mxu1 }
  0xe2   :  { %1382 = vst [vmem:[%s1866_s3 + $0x8] sm:$0xff] %v1230_v58   ;;  %1398 = vst [vmem:[%s1866_s3 + $0x88] sm:$0xff] %v1310_v59   ;;  %v410_v0 = vadd.f32 %v1454_v62, %v1701_v33  ;;  %v538_v1 = vadd.f32 %v1486_v63, %v1701_v33  ;;  %v401_v2 = vpop.f32.mrb[5].mxu0  ;;  %v529_v3 = vpop.f32.mrb[5].mxu1 }
  0xe3   :  { %1226 = vst [vmem:[%s1866_s3] sm:$0xff] %v1225_v60   ;;  %1397 = vst [vmem:[%s1866_s3 + $0x80] sm:$0xff] %v1305_v61   ;;  %v402_v4 = vadd.f32 %v1701_v33, %v401_v2  ;;  %v530_v5 = vadd.f32 %v1701_v33, %v529_v3  ;;  %v1455_v6 = vpop.f32.mrb[6].mxu0  ;;  %v1487_v7 = vpop.f32.mrb[6].mxu1 }
  0xe4   :  { %v413_v8 = vadd.f32 %v1455_v6, %v1701_v33  ;;  %v541_v9 = vadd.f32 %v1487_v7, %v1701_v33  ;;  %v404_v10 = vpop.f32.mrb[7].mxu0  ;;  %v532_v11 = vpop.f32.mrb[7].mxu1  ;;  %v646_v14 = vmax.f32 %v410_v0, 0.0  ;;  %v678_v15 = vmax.f32 %v538_v1, 0.0 }
  0xe5   :  { %v405_v12 = vadd.f32 %v1701_v33, %v404_v10  ;;  %v533_v13 = vadd.f32 %v1701_v33, %v532_v11  ;;  %v644_v18 = vmax.f32 %v402_v4, 0.0  ;;  %v676_v19 = vmax.f32 %v530_v5, 0.0 }
  0xe6   :  { %v647_v16 = vmax.f32 %v413_v8, 0.0  ;;  %v679_v17 = vmax.f32 %v541_v9, 0.0 }
  0xe7   :  { %v645_v20 = vmax.f32 %v405_v12, 0.0  ;;  %v677_v21 = vmax.f32 %v533_v13, 0.0 }
  0xe8   :  { %v1240_v22 = vpack.c.bf16 %v647_v16, %v646_v14  ;;  %v1320_v23 = vpack.c.bf16 %v679_v17, %v678_v15 }
  0xe9   :  { %v1235_v24 = vpack.c.bf16 %v645_v20, %v644_v18  ;;  %v1315_v25 = vpack.c.bf16 %v677_v21, %v676_v19  ;;  %v1458_v26 = vpop.f32.mrb[8].mxu0  ;;  %v1490_v27 = vpop.f32.mrb[8].mxu1 }
  0xea   :  { %1384 = vst [vmem:[%s1866_s3 + $0x18] sm:$0xff] %v1240_v22   ;;  %1400 = vst [vmem:[%s1866_s3 + $0x98] sm:$0xff] %v1320_v23   ;;  %v426_v28 = vadd.f32 %v1458_v26, %v1701_v33  ;;  %v554_v29 = vadd.f32 %v1490_v27, %v1701_v33  ;;  %v417_v30 = vpop.f32.mrb[9].mxu0  ;;  %v545_v31 = vpop.f32.mrb[9].mxu1 }
  0xeb   :  { %1383 = vst [vmem:[%s1866_s3 + $0x10] sm:$0xff] %v1235_v24   ;;  %1399 = vst [vmem:[%s1866_s3 + $0x90] sm:$0xff] %v1315_v25   ;;  %v418_v32 = vadd.f32 %v1701_v33, %v417_v30  ;;  %v546_v34 = vadd.f32 %v1701_v33, %v545_v31  ;;  %v1459_v35 = vpop.f32.mrb[10].mxu0  ;;  %v1491_v36 = vpop.f32.mrb[10].mxu1 }
  0xec   :  { %v429_v37 = vadd.f32 %v1459_v35, %v1701_v33  ;;  %v557_v38 = vadd.f32 %v1491_v36, %v1701_v33  ;;  %v420_v39 = vpop.f32.mrb[11].mxu0  ;;  %v548_v40 = vpop.f32.mrb[11].mxu1  ;;  %v650_v43 = vmax.f32 %v426_v28, 0.0  ;;  %v682_v44 = vmax.f32 %v554_v29, 0.0 }
  0xed   :  { %v421_v41 = vadd.f32 %v1701_v33, %v420_v39  ;;  %v549_v42 = vadd.f32 %v1701_v33, %v548_v40  ;;  %v648_v47 = vmax.f32 %v418_v32, 0.0  ;;  %v680_v48 = vmax.f32 %v546_v34, 0.0 }
  0xee   :  { %v651_v45 = vmax.f32 %v429_v37, 0.0  ;;  %v683_v46 = vmax.f32 %v557_v38, 0.0 }
  0xef   :  { %v649_v49 = vmax.f32 %v421_v41, 0.0  ;;  %v681_v50 = vmax.f32 %v549_v42, 0.0 }
  0xf0   :  { %v1250_v51 = vpack.c.bf16 %v651_v45, %v650_v43  ;;  %v1330_v52 = vpack.c.bf16 %v683_v46, %v682_v44 }
  0xf1   :  { %v1245_v53 = vpack.c.bf16 %v649_v49, %v648_v47  ;;  %v1325_v54 = vpack.c.bf16 %v681_v50, %v680_v48  ;;  %v1462_v55 = vpop.f32.mrb[12].mxu0  ;;  %v1494_v56 = vpop.f32.mrb[12].mxu1 }
  0xf2   :  { %1386 = vst [vmem:[%s1866_s3 + $0x28] sm:$0xff] %v1250_v51   ;;  %1402 = vst [vmem:[%s1866_s3 + $0xa8] sm:$0xff] %v1330_v52   ;;  %v442_v57 = vadd.f32 %v1462_v55, %v1701_v33  ;;  %v570_v58 = vadd.f32 %v1494_v56, %v1701_v33  ;;  %v433_v59 = vpop.f32.mrb[13].mxu0  ;;  %v561_v60 = vpop.f32.mrb[13].mxu1 }
  0xf3   :  { %1385 = vst [vmem:[%s1866_s3 + $0x20] sm:$0xff] %v1245_v53   ;;  %1401 = vst [vmem:[%s1866_s3 + $0xa0] sm:$0xff] %v1325_v54   ;;  %v434_v61 = vadd.f32 %v1701_v33, %v433_v59  ;;  %v562_v62 = vadd.f32 %v1701_v33, %v561_v60  ;;  %v1463_v63 = vpop.f32.mrb[14].mxu0  ;;  %v1495_v0 = vpop.f32.mrb[14].mxu1 }
  0xf4   :  { %v445_v1 = vadd.f32 %v1463_v63, %v1701_v33  ;;  %v573_v2 = vadd.f32 %v1495_v0, %v1701_v33  ;;  %v436_v3 = vpop.f32.mrb[15].mxu0  ;;  %v564_v4 = vpop.f32.mrb[15].mxu1  ;;  %v654_v7 = vmax.f32 %v442_v57, 0.0  ;;  %v686_v8 = vmax.f32 %v570_v58, 0.0 }
  0xf5   :  { %v437_v5 = vadd.f32 %v1701_v33, %v436_v3  ;;  %v565_v6 = vadd.f32 %v1701_v33, %v564_v4  ;;  %v652_v11 = vmax.f32 %v434_v61, 0.0  ;;  %v684_v12 = vmax.f32 %v562_v62, 0.0 }
  0xf6   :  { %v655_v9 = vmax.f32 %v445_v1, 0.0  ;;  %v687_v10 = vmax.f32 %v573_v2, 0.0 }
  0xf7   :  { %v653_v13 = vmax.f32 %v437_v5, 0.0  ;;  %v685_v14 = vmax.f32 %v565_v6, 0.0 }
  0xf8   :  { %v1260_v15 = vpack.c.bf16 %v655_v9, %v654_v7  ;;  %v1340_v16 = vpack.c.bf16 %v687_v10, %v686_v8 }
  0xf9   :  { %v1255_v17 = vpack.c.bf16 %v653_v13, %v652_v11  ;;  %v1335_v18 = vpack.c.bf16 %v685_v14, %v684_v12  ;;  %v1466_v19 = vpop.f32.mrb[16].mxu0  ;;  %v1498_v20 = vpop.f32.mrb[16].mxu1 }
  0xfa   :  { %1388 = vst [vmem:[%s1866_s3 + $0x38] sm:$0xff] %v1260_v15   ;;  %1404 = vst [vmem:[%s1866_s3 + $0xb8] sm:$0xff] %v1340_v16   ;;  %v458_v21 = vadd.f32 %v1466_v19, %v1701_v33  ;;  %v586_v22 = vadd.f32 %v1498_v20, %v1701_v33  ;;  %v449_v23 = vpop.f32.mrb[17].mxu0  ;;  %v577_v24 = vpop.f32.mrb[17].mxu1 }
  0xfb   :  { %1387 = vst [vmem:[%s1866_s3 + $0x30] sm:$0xff] %v1255_v17   ;;  %1403 = vst [vmem:[%s1866_s3 + $0xb0] sm:$0xff] %v1335_v18   ;;  %v450_v25 = vadd.f32 %v1701_v33, %v449_v23  ;;  %v578_v26 = vadd.f32 %v1701_v33, %v577_v24  ;;  %v1467_v27 = vpop.f32.mrb[18].mxu0  ;;  %v1499_v28 = vpop.f32.mrb[18].mxu1 }
  0xfc   :  { %v461_v29 = vadd.f32 %v1467_v27, %v1701_v33  ;;  %v589_v30 = vadd.f32 %v1499_v28, %v1701_v33  ;;  %v452_v31 = vpop.f32.mrb[19].mxu0  ;;  %v580_v32 = vpop.f32.mrb[19].mxu1  ;;  %v658_v36 = vmax.f32 %v458_v21, 0.0  ;;  %v690_v37 = vmax.f32 %v586_v22, 0.0 }
  0xfd   :  { %v453_v34 = vadd.f32 %v1701_v33, %v452_v31  ;;  %v581_v35 = vadd.f32 %v1701_v33, %v580_v32  ;;  %v656_v40 = vmax.f32 %v450_v25, 0.0  ;;  %v688_v41 = vmax.f32 %v578_v26, 0.0 }
  0xfe   :  { %v659_v38 = vmax.f32 %v461_v29, 0.0  ;;  %v691_v39 = vmax.f32 %v589_v30, 0.0 }
  0xff   :  { %v657_v42 = vmax.f32 %v453_v34, 0.0  ;;  %v689_v43 = vmax.f32 %v581_v35, 0.0 }
 0x100   :  { %v1270_v44 = vpack.c.bf16 %v659_v38, %v658_v36  ;;  %v1350_v45 = vpack.c.bf16 %v691_v39, %v690_v37 }
 0x101   :  { %v1265_v46 = vpack.c.bf16 %v657_v42, %v656_v40  ;;  %v1345_v47 = vpack.c.bf16 %v689_v43, %v688_v41  ;;  %v1470_v48 = vpop.f32.mrb[20].mxu0  ;;  %v1502_v49 = vpop.f32.mrb[20].mxu1 }
 0x102   :  { %1390 = vst [vmem:[%s1866_s3 + $0x48] sm:$0xff] %v1270_v44   ;;  %1406 = vst [vmem:[%s1866_s3 + $0xc8] sm:$0xff] %v1350_v45   ;;  %v474_v50 = vadd.f32 %v1470_v48, %v1701_v33  ;;  %v602_v51 = vadd.f32 %v1502_v49, %v1701_v33  ;;  %v465_v52 = vpop.f32.mrb[21].mxu0  ;;  %v593_v53 = vpop.f32.mrb[21].mxu1 }
 0x103   :  { %1389 = vst [vmem:[%s1866_s3 + $0x40] sm:$0xff] %v1265_v46   ;;  %1405 = vst [vmem:[%s1866_s3 + $0xc0] sm:$0xff] %v1345_v47   ;;  %v466_v54 = vadd.f32 %v1701_v33, %v465_v52  ;;  %v594_v55 = vadd.f32 %v1701_v33, %v593_v53  ;;  %v1471_v56 = vpop.f32.mrb[22].mxu0  ;;  %v1503_v57 = vpop.f32.mrb[22].mxu1 }
 0x104   :  { %v477_v58 = vadd.f32 %v1471_v56, %v1701_v33  ;;  %v605_v59 = vadd.f32 %v1503_v57, %v1701_v33  ;;  %v468_v60 = vpop.f32.mrb[23].mxu0  ;;  %v596_v61 = vpop.f32.mrb[23].mxu1  ;;  %v662_v0 = vmax.f32 %v474_v50, 0.0  ;;  %v694_v1 = vmax.f32 %v602_v51, 0.0 }
 0x105   :  { %v469_v62 = vadd.f32 %v1701_v33, %v468_v60  ;;  %v597_v63 = vadd.f32 %v1701_v33, %v596_v61  ;;  %v660_v4 = vmax.f32 %v466_v54, 0.0  ;;  %v692_v5 = vmax.f32 %v594_v55, 0.0 }
 0x106   :  { %v663_v2 = vmax.f32 %v477_v58, 0.0  ;;  %v695_v3 = vmax.f32 %v605_v59, 0.0 }
 0x107   :  { %v661_v6 = vmax.f32 %v469_v62, 0.0  ;;  %v693_v7 = vmax.f32 %v597_v63, 0.0 }
 0x108   :  { %v1280_v8 = vpack.c.bf16 %v663_v2, %v662_v0  ;;  %v1360_v9 = vpack.c.bf16 %v695_v3, %v694_v1 }
 0x109   :  { %v1275_v10 = vpack.c.bf16 %v661_v6, %v660_v4  ;;  %v1355_v11 = vpack.c.bf16 %v693_v7, %v692_v5  ;;  %v1474_v12 = vpop.f32.mrb[24].mxu0  ;;  %v1506_v13 = vpop.f32.mrb[24].mxu1 }
 0x10a   :  { %1392 = vst [vmem:[%s1866_s3 + $0x58] sm:$0xff] %v1280_v8   ;;  %1408 = vst [vmem:[%s1866_s3 + $0xd8] sm:$0xff] %v1360_v9   ;;  %v490_v14 = vadd.f32 %v1474_v12, %v1701_v33  ;;  %v618_v15 = vadd.f32 %v1506_v13, %v1701_v33  ;;  %v481_v16 = vpop.f32.mrb[25].mxu0  ;;  %v609_v17 = vpop.f32.mrb[25].mxu1 }
 0x10b   :  { %1391 = vst [vmem:[%s1866_s3 + $0x50] sm:$0xff] %v1275_v10   ;;  %1407 = vst [vmem:[%s1866_s3 + $0xd0] sm:$0xff] %v1355_v11   ;;  %v482_v18 = vadd.f32 %v1701_v33, %v481_v16  ;;  %v610_v19 = vadd.f32 %v1701_v33, %v609_v17  ;;  %v1475_v20 = vpop.f32.mrb[26].mxu0  ;;  %v1507_v21 = vpop.f32.mrb[26].mxu1 }
 0x10c   :  { %v493_v22 = vadd.f32 %v1475_v20, %v1701_v33  ;;  %v621_v23 = vadd.f32 %v1507_v21, %v1701_v33  ;;  %v484_v24 = vpop.f32.mrb[27].mxu0  ;;  %v612_v25 = vpop.f32.mrb[27].mxu1  ;;  %v666_v28 = vmax.f32 %v490_v14, 0.0  ;;  %v698_v29 = vmax.f32 %v618_v15, 0.0 }
 0x10d   :  { %v485_v26 = vadd.f32 %v1701_v33, %v484_v24  ;;  %v613_v27 = vadd.f32 %v1701_v33, %v612_v25  ;;  %v664_v32 = vmax.f32 %v482_v18, 0.0  ;;  %v696_v34 = vmax.f32 %v610_v19, 0.0 }
 0x10e   :  { %v667_v30 = vmax.f32 %v493_v22, 0.0  ;;  %v699_v31 = vmax.f32 %v621_v23, 0.0 }
 0x10f   :  { %v665_v35 = vmax.f32 %v485_v26, 0.0  ;;  %v697_v36 = vmax.f32 %v613_v27, 0.0 }
 0x110   :  { %v1290_v37 = vpack.c.bf16 %v667_v30, %v666_v28  ;;  %v1370_v38 = vpack.c.bf16 %v699_v31, %v698_v29 }
 0x111   :  { %v1285_v39 = vpack.c.bf16 %v665_v35, %v664_v32  ;;  %v1365_v40 = vpack.c.bf16 %v697_v36, %v696_v34  ;;  %v1478_v41 = vpop.f32.mrb[28].mxu0  ;;  %v1510_v42 = vpop.f32.mrb[28].mxu1 }
 0x112   :  { %1394 = vst [vmem:[%s1866_s3 + $0x68] sm:$0xff] %v1290_v37   ;;  %1410 = vst [vmem:[%s1866_s3 + $0xe8] sm:$0xff] %v1370_v38   ;;  %v506_v43 = vadd.f32 %v1478_v41, %v1701_v33  ;;  %v634_v44 = vadd.f32 %v1510_v42, %v1701_v33  ;;  %v497_v45 = vpop.f32.mrb[29].mxu0  ;;  %v625_v46 = vpop.f32.mrb[29].mxu1 }
 0x113   :  { %1393 = vst [vmem:[%s1866_s3 + $0x60] sm:$0xff] %v1285_v39   ;;  %1409 = vst [vmem:[%s1866_s3 + $0xe0] sm:$0xff] %v1365_v40   ;;  %v498_v47 = vadd.f32 %v1701_v33, %v497_v45  ;;  %v626_v48 = vadd.f32 %v1701_v33, %v625_v46  ;;  %v1479_v49 = vpop.f32.mrb[30].mxu0  ;;  %v1511_v50 = vpop.f32.mrb[30].mxu1 }
 0x114   :  { %v509_v51 = vadd.f32 %v1479_v49, %v1701_v33  ;;  %v637_v52 = vadd.f32 %v1511_v50, %v1701_v33  ;;  %v500_v53 = vpop.f32.mrb[31].mxu0  ;;  %v628_v54 = vpop.f32.mrb[31].mxu1  ;;  %v670_v57 = vmax.f32 %v506_v43, 0.0  ;;  %v702_v58 = vmax.f32 %v634_v44, 0.0 }
 0x115   :  { %v501_v55 = vadd.f32 %v1701_v33, %v500_v53  ;;  %v629_v56 = vadd.f32 %v1701_v33, %v628_v54  ;;  %v668_v61 = vmax.f32 %v498_v47, 0.0  ;;  %v700_v62 = vmax.f32 %v626_v48, 0.0 }
 0x116   :  { %v671_v59 = vmax.f32 %v509_v51, 0.0  ;;  %v703_v60 = vmax.f32 %v637_v52, 0.0 }
 0x117   :  { %v669_v63 = vmax.f32 %v501_v55, 0.0  ;;  %v701_v0 = vmax.f32 %v629_v56, 0.0 }
 0x118   :  { %v1300_v1 = vpack.c.bf16 %v671_v59, %v670_v57  ;;  %v1380_v2 = vpack.c.bf16 %v703_v60, %v702_v58 }
 0x119   :  { %v1295_v3 = vpack.c.bf16 %v669_v63, %v668_v61  ;;  %v1375_v4 = vpack.c.bf16 %v701_v0, %v700_v62 }
 0x11a   :  { %1396 = vst [vmem:[%s1866_s3 + $0x78] sm:$0xff] %v1300_v1   ;;  %1412 = vst [vmem:[%s1866_s3 + $0xf8] sm:$0xff] %v1380_v2  }
 0x11b   :  { %1395 = vst [vmem:[%s1866_s3 + $0x70] sm:$0xff] %v1295_v3   ;;  %1411 = vst [vmem:[%s1866_s3 + $0xf0] sm:$0xff] %v1375_v4  }

</bundles_post_ra>
